<compile_context>
chip_gen: v7x
topology: tpu7x:2x2x1
jax: 0.10.0
libtpu: 0.0.40
codegen_flags: <defaults>
</compile_context>

<pallas_src>
import numpy as np
import jax
import jax.numpy as jnp
from jax import lax
from jax.experimental import pallas as pl
from jax.experimental.pallas import tpu as pltpu

_LANE = 128


def _lovasz_kernel(gts_ref, err_ref, fg_ref, out_ref, carry_ref, prevj_ref):
    # gts_ref  : [Cg, 1, 1]      f32  per-class foreground totals (whole image)
    # err_ref  : [Cg, NCH, 128]  f32  errors sorted descending per class (pixel tile t)
    # fg_ref   : [Cg, NCH, 128]  i8   foreground mask permuted by the same order (0/1)
    # out_ref  : [Cg, 1, 1]      f32  per-class dot(err_sorted, lovasz_grad) (accumulated)
    # carry_ref/prevj_ref : [Cg,1,1] f32 scratch carried across pixel tiles
    t = pl.program_id(1)

    @pl.when(t == 0)
    def _init():
        carry_ref[...] = jnp.zeros_like(carry_ref)
        prevj_ref[...] = jnp.zeros_like(prevj_ref)
        out_ref[...] = jnp.zeros_like(out_ref)

    err = err_ref[...]                          # [Cg, NCH, 128] f32
    fg = fg_ref[...].astype(jnp.float32)        # int8 0/1 -> f32 (exact)
    Cg, NCH, L = err.shape

    lane = lax.broadcasted_iota(jnp.int32, (Cg, NCH, L), 2)
    chunk = lax.broadcasted_iota(jnp.int32, (Cg, NCH, L), 1)

    # ---- level 1: inclusive prefix sum of fg within each 128-lane chunk (7 passes) ----
    cum = fg
    s = 1
    while s < L:                                # static (L == 128)
        rolled = pltpu.roll(cum, shift=s, axis=2)
        cum = cum + jnp.where(lane >= s, rolled, 0.0)
        s *= 2

    # ---- level 2: exclusive scan of per-chunk totals along the (tiny) chunk axis ----
    tot = cum[:, :, L - 1:L]                    # [Cg, NCH, 1] chunk totals
    if NCH > 1:
        cidx = lax.broadcasted_iota(jnp.int32, (Cg, NCH, 1), 1)
        ctot = tot
        s = 1
        while s < NCH:                          # static (NCH is a trace-time const)
            rolled = pltpu.roll(ctot, shift=s, axis=1)
            ctot = ctot + jnp.where(cidx >= s, rolled, 0.0)
            s *= 2
        chunk_off = ctot - tot                  # exclusive chunk offsets
    else:
        chunk_off = jnp.zeros_like(tot)

    # global inclusive cumsum of fg_sorted (exact: integer values < 2**24 in f32)
    cum_fg = cum + chunk_off + carry_ref[...]

    # global 1-indexed positions
    pos = (t * (NCH * L) + chunk * L + lane + 1).astype(jnp.float32)

    gts = gts_ref[...]                          # [Cg, 1, 1]
    intersection = gts - cum_fg                 # gts - cumsum(fg_sorted)
    union = gts + (pos - cum_fg)                # gts + cumsum(1 - fg_sorted)  (> 0 always)
    jac = 1.0 - intersection / union

    # lovasz_grad: first difference of jac, first element kept (prevj starts at 0)
    prev_lane = pltpu.roll(jac, shift=1, axis=2)              # within-chunk previous
    last_lane = jac[:, :, L - 1:L]                            # [Cg, NCH, 1]
    prev_chunk = pltpu.roll(last_lane, shift=1, axis=1)       # previous chunk's last value
    prev0 = jnp.where(chunk == 0, prevj_ref[...], prev_chunk)  # tile-boundary carry
    prev = jnp.where(lane == 0, prev0, prev_lane)
    grad = jac - prev

    contrib = jnp.sum(jnp.sum(err * grad, axis=2, keepdims=True), axis=1, keepdims=True)
    out_ref[...] = out_ref[...] + contrib
    carry_ref[...] = cum_fg[:, NCH - 1:NCH, L - 1:L]
    prevj_ref[...] = jac[:, NCH - 1:NCH, L - 1:L]


def _tpu_generation_params():
    """Per-generation VMEM budgets and class-group count (v7x: split classes over 2 TCs)."""
    kind = ""
    try:
        kind = jax.devices()[0].device_kind.lower()
    except Exception:
        pass
    if "v7" in kind:
        # v7x: 64 MiB VMEM per TensorCore, 2 TCs -> class-parallel split.
        return dict(vmem_limit=40 * 1024 * 1024, tile_budget=16 * 1024 * 1024, class_groups=2)
    if "v5 lite" in kind or "v5e" in kind or "v5litepod" in kind:
        # v5e: 128 MiB physical, but 16 MiB scoped default -> raise the limit explicitly.
        return dict(vmem_limit=80 * 1024 * 1024, tile_budget=28 * 1024 * 1024, class_groups=1)
    # v6e (and default): 128 MiB VMEM, single TensorCore.
    return dict(vmem_limit=80 * 1024 * 1024, tile_budget=32 * 1024 * 1024, class_groups=1)


def _choose_tile(c_pad, P, tp_request, budget_bytes):
    """Pick the pixel tile TP (multiple of 4096 when multi-tile, else the whole padded P)."""
    # rough per-(class,pixel) VMEM footprint: double-buffered inputs 2*(4+1) B
    # plus ~6 live f32-sized temporaries in the scan / jaccard math.
    per_px = 34 * c_pad
    cap = max(4096, (budget_bytes // per_px) // 4096 * 4096)
    target = 8192 if tp_request is None else max(_LANE, int(tp_request))
    pp1 = -(-P // _LANE) * _LANE
    if pp1 <= target and pp1 <= cap:
        return pp1, 1                                   # single tile
    tile = min(max(4096, (target // 4096) * 4096), cap)  # NCH % 32 == 0 (int8 tiling safe)
    n = -(-P // tile)
    if n == 1:
        return pp1, 1
    return tile, n


def lovasz_softmax_pallas(probas, labels, ignore=None, tp=None, class_groups=None):
    """Equivalent of Lovasz_loss(ignore=None)(probas, labels).

    probas: [B, C, H, W] softmax probabilities (NCHW), labels: [B, H, W] int.
    """
    # TODO(synk): ignore-index filtering yields a data-dependent number of valid pixels
    # (dynamic shapes) with no clean static-shape Pallas equivalent; only ignore=None.
    assert ignore is None
    B, C, H, W = probas.shape
    P = B * H * W

    hw = _tpu_generation_params()
    ng = class_groups if class_groups is not None else hw["class_groups"]
    ng = max(1, min(int(ng), C))
    cg = -(-C // ng)
    c_pad = ng * cg

    # ---- glue: per-class fg mask, errors, totals ---------------------------------
    probas_cp = jnp.transpose(probas, (1, 0, 2, 3)).reshape(C, P).astype(jnp.float32)
    labels_flat = labels.reshape(P)
    classes = jnp.arange(C, dtype=labels_flat.dtype)
    fg_i8 = (labels_flat[None, :] == classes[:, None]).astype(jnp.int8)     # [C, P]
    fg_f32 = fg_i8.astype(jnp.float32)
    err = jnp.abs(fg_f32 - probas_cp)                                       # [C, P]
    gts = jnp.sum(fg_f32, axis=1)                                           # [C]

    # single fused key/value sort: key = -err (descending err), fg rides along
    neg_sorted, fg_sorted = lax.sort((-err, fg_i8), dimension=1, num_keys=1, is_stable=False)
    err_sorted = -neg_sorted

    # ---- tiling over the pixel axis ----------------------------------------------
    tp_sel, num_tiles = _choose_tile(c_pad, P, tp, hw["tile_budget"])
    pp = tp_sel * num_tiles
    assert pp < (1 << 24), "f32 positions/cumsums lose exactness beyond 2**24 pixels"
    nch = tp_sel // _LANE
    nch_tot = pp // _LANE

    pad_p = pp - P
    pad_c = c_pad - C
    if pad_p or pad_c:
        # pad AFTER the sort with (err=0, fg=0) -> exactly zero contribution
        err_sorted = jnp.pad(err_sorted, ((0, pad_c), (0, pad_p)))
        fg_sorted = jnp.pad(fg_sorted, ((0, pad_c), (0, pad_p)))
    err3 = err_sorted.reshape(c_pad, nch_tot, _LANE)     # row-major: free reshape
    fg3 = fg_sorted.reshape(c_pad, nch_tot, _LANE)
    gts3 = jnp.pad(gts, (0, pad_c)).reshape(c_pad, 1, 1)

    dots = pl.pallas_call(
        _lovasz_kernel,
        out_shape=jax.ShapeDtypeStruct((c_pad, 1, 1), jnp.float32),
        grid_spec=pltpu.PrefetchScalarGridSpec(
            num_scalar_prefetch=0,
            grid=(ng, num_tiles),                                   # (class groups, pixel tiles)
            in_specs=[
                pl.BlockSpec((cg, 1, 1), lambda g, t: (g, 0, 0)),     # gts (resident, tiny)
                pl.BlockSpec((cg, nch, _LANE), lambda g, t: (g, t, 0)),  # err tile  (f32)
                pl.BlockSpec((cg, nch, _LANE), lambda g, t: (g, t, 0)),  # fg tile   (int8)
            ],
            out_specs=pl.BlockSpec((cg, 1, 1), lambda g, t: (g, 0, 0)),  # per-class dots
            scratch_shapes=[
                pltpu.VMEM((cg, 1, 1), jnp.float32),                  # running cumsum carry
                pltpu.VMEM((cg, 1, 1), jnp.float32),                  # previous-tile jaccard
            ],
        ),
        compiler_params=pltpu.CompilerParams(
            dimension_semantics=("parallel", "arbitrary"),
            vmem_limit_bytes=hw["vmem_limit"],
        ),
    )(gts3, err3, fg3)

    # present-class mask + mean in glue (<= C scalars)
    dots = dots.reshape(c_pad)[:C]
    present = (gts > 0.0).astype(jnp.float32)
    n_present = jnp.sum(present)
    return jnp.sum(dots * present) / jnp.maximum(n_present, 1.0)


def _lovasz_softmax_ref(probas, labels):
    """Numpy reference mirroring lovasz_softmax (per_image=False, classes='present')."""
    probas = np.asarray(probas, dtype=np.float64)
    labels = np.asarray(labels)
    B, C, H, W = probas.shape
    p = np.transpose(probas, (0, 2, 3, 1)).reshape(-1, C)
    l = labels.reshape(-1)
    losses = []
    for c in range(C):
        fg = (l == c).astype(np.float64)
        if fg.sum() == 0:
            continue
        errors = np.abs(fg - p[:, c])
        order = np.argsort(-errors, kind="stable")
        errors_sorted = errors[order]
        fg_sorted = fg[order]
        gts = fg_sorted.sum()
        inter = gts - np.cumsum(fg_sorted)
        union = gts + np.cumsum(1.0 - fg_sorted)
        jac = 1.0 - inter / union
        grad = np.concatenate([jac[:1], jac[1:] - jac[:-1]])
        losses.append(np.dot(errors_sorted, grad))
    return float(np.mean(losses)) if losses else 0.0


if __name__ == "__main__":
    key = jax.random.PRNGKey(0)
    k1, k2, k3, k4 = jax.random.split(key, 4)

    # 1) small single-tile case (module-sized shapes)
    B, C, H, W = 2, 4, 16, 16
    probas = jax.nn.softmax(jax.random.normal(k1, (B, C, H, W), dtype=jnp.float32), axis=1)
    labels = jax.random.randint(k2, (B, H, W), 0, C, dtype=jnp.int32)
    ref = _lovasz_softmax_ref(np.asarray(probas), np.asarray(labels))
    out = jax.block_until_ready(lovasz_softmax_pallas(probas, labels, ignore=None))
    assert np.allclose(float(out), ref, rtol=1e-4, atol=1e-5), (float(out), ref)

    # 2) multi-tile case: P = 8192, TP = 4096 -> 2 pixel tiles (exercises cumsum/jaccard carries)
    B2, C2, H2, W2 = 2, 4, 64, 64
    probas2 = jax.nn.softmax(jax.random.normal(k3, (B2, C2, H2, W2), dtype=jnp.float32), axis=1)
    labels2 = jax.random.randint(k4, (B2, H2, W2), 0, C2, dtype=jnp.int32)
    ref2 = _lovasz_softmax_ref(np.asarray(probas2), np.asarray(labels2))
    out2 = jax.block_until_ready(lovasz_softmax_pallas(probas2, labels2, ignore=None, tp=4096))
    assert np.allclose(float(out2), ref2, rtol=1e-4, atol=1e-5), (float(out2), ref2)

    # 3) v7x-style class-group split (runs sequentially and correctly on 1-TC chips too)
    out3 = jax.block_until_ready(
        lovasz_softmax_pallas(probas2, labels2, ignore=None, tp=4096, class_groups=2))
    assert np.allclose(float(out3), ref2, rtol=1e-4, atol=1e-5), (float(out3), ref2)

    print("KERNEL_OK")
</pallas_src>

<mosaic_0001>
module attributes {stable_mosaic.version = 11 : i64} {
  func.func @_lovasz_kernel(%arg0: i32, %arg1: i32, %arg2: memref<4x1x1xf32, #tpu.memory_space<vmem>>, %arg3: memref<4x4x128xf32, #tpu.memory_space<vmem>>, %arg4: memref<4x4x128xi8, #tpu.memory_space<vmem>>, %arg5: memref<4x1x1xf32, #tpu.memory_space<vmem>>, %arg6: memref<4x1x1xf32, #tpu.memory_space<vmem>>, %arg7: memref<4x1x1xf32, #tpu.memory_space<vmem>>) attributes {dimension_semantics = [#tpu.dimension_semantics<parallel>, #tpu.dimension_semantics<arbitrary>], iteration_bounds = array<i64: 1, 1>, scalar_prefetch = 0 : i64, scratch_operands = 2 : i64, tpu.core_type = #tpu.core_type<tc>, window_params = [{transform_indices = @transform_0, window_bounds = array<i64: 4, 1, 1>}, {transform_indices = @transform_1, window_bounds = array<i64: 4, 4, 128>}, {transform_indices = @transform_2, window_bounds = array<i64: 4, 4, 128>}, {transform_indices = @transform_3, window_bounds = array<i64: 4, 1, 1>}]} {
    %c0_i32 = arith.constant 0 : i32
    %0 = arith.cmpi eq, %arg1, %c0_i32 : i32
    %1 = arith.extui %0 : i1 to i32
    %c0_i32_0 = arith.constant 0 : i32
    %2 = arith.cmpi ne, %1, %c0_i32_0 : i32
    scf.if %2 {
      %cst_54 = arith.constant 0.000000e+00 : f32
      %115 = vector.broadcast %cst_54 : f32 to vector<4x1x1xf32>
      %c0_55 = arith.constant 0 : index
      %c0_56 = arith.constant 0 : index
      %c0_57 = arith.constant 0 : index
      %116 = vector.load %arg6[%c0_55, %c0_56, %c0_57] : memref<4x1x1xf32, #tpu.memory_space<vmem>>, vector<4x1x1xf32>
      tpu.vector_store %arg6[%c0_55, %c0_56, %c0_57], %115 {strides = array<i32>} : memref<4x1x1xf32, #tpu.memory_space<vmem>>, vector<4x1x1xf32>,
      %cst_58 = arith.constant 0.000000e+00 : f32
      %117 = vector.broadcast %cst_58 : f32 to vector<4x1x1xf32>
      %c0_59 = arith.constant 0 : index
      %c0_60 = arith.constant 0 : index
      %c0_61 = arith.constant 0 : index
      %118 = vector.load %arg7[%c0_59, %c0_60, %c0_61] : memref<4x1x1xf32, #tpu.memory_space<vmem>>, vector<4x1x1xf32>
      tpu.vector_store %arg7[%c0_59, %c0_60, %c0_61], %117 {strides = array<i32>} : memref<4x1x1xf32, #tpu.memory_space<vmem>>, vector<4x1x1xf32>,
      %cst_62 = arith.constant 0.000000e+00 : f32
      %119 = vector.broadcast %cst_62 : f32 to vector<4x1x1xf32>
      %c0_63 = arith.constant 0 : index
      %c0_64 = arith.constant 0 : index
      %c0_65 = arith.constant 0 : index
      %120 = vector.load %arg5[%c0_63, %c0_64, %c0_65] : memref<4x1x1xf32, #tpu.memory_space<vmem>>, vector<4x1x1xf32>
      tpu.vector_store %arg5[%c0_63, %c0_64, %c0_65], %119 {strides = array<i32>} : memref<4x1x1xf32, #tpu.memory_space<vmem>>, vector<4x1x1xf32>,
    } else {
    }
    %c0 = arith.constant 0 : index
    %c0_1 = arith.constant 0 : index
    %c0_2 = arith.constant 0 : index
    %3 = vector.load %arg3[%c0, %c0_1, %c0_2] : memref<4x4x128xf32, #tpu.memory_space<vmem>>, vector<4x4x128xf32>
    %c0_3 = arith.constant 0 : index
    %c0_4 = arith.constant 0 : index
    %c0_5 = arith.constant 0 : index
    %4 = vector.load %arg4[%c0_3, %c0_4, %c0_5] : memref<4x4x128xi8, #tpu.memory_space<vmem>>, vector<4x4x128xi8>
    %5 = arith.sitofp %4 : vector<4x4x128xi8> to vector<4x4x128xf32>
    %6 = tpu.iota {dimensions = array<i32: 2>} : vector<4x4x128xi32>
    %7 = tpu.iota {dimensions = array<i32: 1>} : vector<4x4x128xi32>
    %c1_i32 = arith.constant 1 : i32
    %8 = tpu.dynamic_rotate %5 by %c1_i32 dim 2 : vector<4x4x128xf32>, i32 -> vector<4x4x128xf32>
    %c1_i32_6 = arith.constant 1 : i32
    %9 = vector.broadcast %c1_i32_6 : i32 to vector<4x4x128xi32>
    %10 = arith.cmpi sge, %6, %9 : vector<4x4x128xi32>
    %cst = arith.constant 0.000000e+00 : f32
    %11 = vector.broadcast %cst : f32 to vector<4x4x128xf32>
    %12 = arith.select %10, %8, %11 : vector<4x4x128xi1>, vector<4x4x128xf32>
    %13 = arith.addf %5, %12 : vector<4x4x128xf32>
    %c2_i32 = arith.constant 2 : i32
    %14 = tpu.dynamic_rotate %13 by %c2_i32 dim 2 : vector<4x4x128xf32>, i32 -> vector<4x4x128xf32>
    %c2_i32_7 = arith.constant 2 : i32
    %15 = vector.broadcast %c2_i32_7 : i32 to vector<4x4x128xi32>
    %16 = arith.cmpi sge, %6, %15 : vector<4x4x128xi32>
    %cst_8 = arith.constant 0.000000e+00 : f32
    %17 = vector.broadcast %cst_8 : f32 to vector<4x4x128xf32>
    %18 = arith.select %16, %14, %17 : vector<4x4x128xi1>, vector<4x4x128xf32>
    %19 = arith.addf %13, %18 : vector<4x4x128xf32>
    %c4_i32 = arith.constant 4 : i32
    %20 = tpu.dynamic_rotate %19 by %c4_i32 dim 2 : vector<4x4x128xf32>, i32 -> vector<4x4x128xf32>
    %c4_i32_9 = arith.constant 4 : i32
    %21 = vector.broadcast %c4_i32_9 : i32 to vector<4x4x128xi32>
    %22 = arith.cmpi sge, %6, %21 : vector<4x4x128xi32>
    %cst_10 = arith.constant 0.000000e+00 : f32
    %23 = vector.broadcast %cst_10 : f32 to vector<4x4x128xf32>
    %24 = arith.select %22, %20, %23 : vector<4x4x128xi1>, vector<4x4x128xf32>
    %25 = arith.addf %19, %24 : vector<4x4x128xf32>
    %c8_i32 = arith.constant 8 : i32
    %26 = tpu.dynamic_rotate %25 by %c8_i32 dim 2 : vector<4x4x128xf32>, i32 -> vector<4x4x128xf32>
    %c8_i32_11 = arith.constant 8 : i32
    %27 = vector.broadcast %c8_i32_11 : i32 to vector<4x4x128xi32>
    %28 = arith.cmpi sge, %6, %27 : vector<4x4x128xi32>
    %cst_12 = arith.constant 0.000000e+00 : f32
    %29 = vector.broadcast %cst_12 : f32 to vector<4x4x128xf32>
    %30 = arith.select %28, %26, %29 : vector<4x4x128xi1>, vector<4x4x128xf32>
    %31 = arith.addf %25, %30 : vector<4x4x128xf32>
    %c16_i32 = arith.constant 16 : i32
    %32 = tpu.dynamic_rotate %31 by %c16_i32 dim 2 : vector<4x4x128xf32>, i32 -> vector<4x4x128xf32>
    %c16_i32_13 = arith.constant 16 : i32
    %33 = vector.broadcast %c16_i32_13 : i32 to vector<4x4x128xi32>
    %34 = arith.cmpi sge, %6, %33 : vector<4x4x128xi32>
    %cst_14 = arith.constant 0.000000e+00 : f32
    %35 = vector.broadcast %cst_14 : f32 to vector<4x4x128xf32>
    %36 = arith.select %34, %32, %35 : vector<4x4x128xi1>, vector<4x4x128xf32>
    %37 = arith.addf %31, %36 : vector<4x4x128xf32>
    %c32_i32 = arith.constant 32 : i32
    %38 = tpu.dynamic_rotate %37 by %c32_i32 dim 2 : vector<4x4x128xf32>, i32 -> vector<4x4x128xf32>
    %c32_i32_15 = arith.constant 32 : i32
    %39 = vector.broadcast %c32_i32_15 : i32 to vector<4x4x128xi32>
    %40 = arith.cmpi sge, %6, %39 : vector<4x4x128xi32>
    %cst_16 = arith.constant 0.000000e+00 : f32
    %41 = vector.broadcast %cst_16 : f32 to vector<4x4x128xf32>
    %42 = arith.select %40, %38, %41 : vector<4x4x128xi1>, vector<4x4x128xf32>
    %43 = arith.addf %37, %42 : vector<4x4x128xf32>
    %c64_i32 = arith.constant 64 : i32
    %44 = tpu.dynamic_rotate %43 by %c64_i32 dim 2 : vector<4x4x128xf32>, i32 -> vector<4x4x128xf32>
    %c64_i32_17 = arith.constant 64 : i32
    %45 = vector.broadcast %c64_i32_17 : i32 to vector<4x4x128xi32>
    %46 = arith.cmpi sge, %6, %45 : vector<4x4x128xi32>
    %cst_18 = arith.constant 0.000000e+00 : f32
    %47 = vector.broadcast %cst_18 : f32 to vector<4x4x128xf32>
    %48 = arith.select %46, %44, %47 : vector<4x4x128xi1>, vector<4x4x128xf32>
    %49 = arith.addf %43, %48 : vector<4x4x128xf32>
    %50 = vector.extract_strided_slice %49 {offsets = [0, 0, 127], sizes = [4, 4, 1], strides = [1, 1, 1]} : vector<4x4x128xf32> to vector<4x4x1xf32>
    %51 = tpu.iota {dimensions = array<i32: 1>} : vector<4x4x1xi32>
    %c1_i32_19 = arith.constant 1 : i32
    %52 = tpu.dynamic_rotate %50 by %c1_i32_19 dim 1 : vector<4x4x1xf32>, i32 -> vector<4x4x1xf32>
    %c1_i32_20 = arith.constant 1 : i32
    %53 = vector.broadcast %c1_i32_20 : i32 to vector<4x4x1xi32>
    %54 = arith.cmpi sge, %51, %53 : vector<4x4x1xi32>
    %cst_21 = arith.constant 0.000000e+00 : f32
    %55 = vector.broadcast %cst_21 : f32 to vector<4x4x1xf32>
    %56 = arith.select %54, %52, %55 : vector<4x4x1xi1>, vector<4x4x1xf32>
    %57 = arith.addf %50, %56 : vector<4x4x1xf32>
    %c2_i32_22 = arith.constant 2 : i32
    %58 = tpu.dynamic_rotate %57 by %c2_i32_22 dim 1 : vector<4x4x1xf32>, i32 -> vector<4x4x1xf32>
    %c2_i32_23 = arith.constant 2 : i32
    %59 = vector.broadcast %c2_i32_23 : i32 to vector<4x4x1xi32>
    %60 = arith.cmpi sge, %51, %59 : vector<4x4x1xi32>
    %cst_24 = arith.constant 0.000000e+00 : f32
    %61 = vector.broadcast %cst_24 : f32 to vector<4x4x1xf32>
    %62 = arith.select %60, %58, %61 : vector<4x4x1xi1>, vector<4x4x1xf32>
    %63 = arith.addf %57, %62 : vector<4x4x1xf32>
    %64 = arith.subf %63, %50 : vector<4x4x1xf32>
    %65 = vector.broadcast %64 : vector<4x4x1xf32> to vector<4x4x128xf32>
    %66 = arith.addf %49, %65 : vector<4x4x128xf32>
    %c0_25 = arith.constant 0 : index
    %c0_26 = arith.constant 0 : index
    %c0_27 = arith.constant 0 : index
    %67 = vector.load %arg6[%c0_25, %c0_26, %c0_27] : memref<4x1x1xf32, #tpu.memory_space<vmem>>, vector<4x1x1xf32>
    %68 = vector.broadcast %67 : vector<4x1x1xf32> to vector<4x4x128xf32>
    %69 = arith.addf %66, %68 : vector<4x4x128xf32>
    %c512_i32 = arith.constant 512 : i32
    %70 = arith.muli %arg1, %c512_i32 : i32
    %c128_i32 = arith.constant 128 : i32
    %71 = vector.broadcast %c128_i32 : i32 to vector<4x4x128xi32>
    %72 = arith.muli %7, %71 : vector<4x4x128xi32>
    %73 = vector.broadcast %70 : i32 to vector<4x4x128xi32>
    %74 = arith.addi %73, %72 : vector<4x4x128xi32>
    %75 = arith.addi %74, %6 : vector<4x4x128xi32>
    %c1_i32_28 = arith.constant 1 : i32
    %76 = vector.broadcast %c1_i32_28 : i32 to vector<4x4x128xi32>
    %77 = arith.addi %75, %76 : vector<4x4x128xi32>
    %78 = arith.sitofp %77 : vector<4x4x128xi32> to vector<4x4x128xf32>
    %c0_29 = arith.constant 0 : index
    %c0_30 = arith.constant 0 : index
    %c0_31 = arith.constant 0 : index
    %79 = vector.load %arg2[%c0_29, %c0_30, %c0_31] : memref<4x1x1xf32, #tpu.memory_space<vmem>>, vector<4x1x1xf32>
    %80 = vector.broadcast %79 : vector<4x1x1xf32> to vector<4x4x128xf32>
    %81 = arith.subf %80, %69 : vector<4x4x128xf32>
    %82 = arith.subf %78, %69 : vector<4x4x128xf32>
    %83 = vector.broadcast %79 : vector<4x1x1xf32> to vector<4x4x128xf32>
    %84 = arith.addf %83, %82 : vector<4x4x128xf32>
    %85 = arith.divf %81, %84 : vector<4x4x128xf32>
    %cst_32 = arith.constant 1.000000e+00 : f32
    %86 = vector.broadcast %cst_32 : f32 to vector<4x4x128xf32>
    %87 = arith.subf %86, %85 : vector<4x4x128xf32>
    %c1_i32_33 = arith.constant 1 : i32
    %88 = tpu.dynamic_rotate %87 by %c1_i32_33 dim 2 : vector<4x4x128xf32>, i32 -> vector<4x4x128xf32>
    %89 = vector.extract_strided_slice %87 {offsets = [0, 0, 127], sizes = [4, 4, 1], strides = [1, 1, 1]} : vector<4x4x128xf32> to vector<4x4x1xf32>
    %c1_i32_34 = arith.constant 1 : i32
    %90 = tpu.dynamic_rotate %89 by %c1_i32_34 dim 1 : vector<4x4x1xf32>, i32 -> vector<4x4x1xf32>
    %c0_i32_35 = arith.constant 0 : i32
    %91 = vector.broadcast %c0_i32_35 : i32 to vector<4x4x128xi32>
    %92 = arith.cmpi eq, %7, %91 : vector<4x4x128xi32>
    %c0_36 = arith.constant 0 : index
    %c0_37 = arith.constant 0 : index
    %c0_38 = arith.constant 0 : index
    %93 = vector.load %arg7[%c0_36, %c0_37, %c0_38] : memref<4x1x1xf32, #tpu.memory_space<vmem>>, vector<4x1x1xf32>
    %94 = vector.shape_cast %93 : vector<4x1x1xf32> to vector<4x1x1xf32>
    %95 = vector.broadcast %94 : vector<4x1x1xf32> to vector<4x4x128xf32>
    %96 = vector.shape_cast %90 : vector<4x4x1xf32> to vector<4x4x1xf32>
    %97 = vector.broadcast %96 : vector<4x4x1xf32> to vector<4x4x128xf32>
    %98 = arith.select %92, %95, %97 : vector<4x4x128xi1>, vector<4x4x128xf32>
    %c0_i32_39 = arith.constant 0 : i32
    %99 = vector.broadcast %c0_i32_39 : i32 to vector<4x4x128xi32>
    %100 = arith.cmpi eq, %6, %99 : vector<4x4x128xi32>
    %101 = arith.select %100, %98, %88 : vector<4x4x128xi1>, vector<4x4x128xf32>
    %102 = arith.subf %87, %101 : vector<4x4x128xf32>
    %103 = arith.mulf %3, %102 : vector<4x4x128xf32>
    %cst_40 = arith.constant dense<0.000000e+00> : vector<4x4xf32>
    %104 = vector.multi_reduction <add>, %103, %cst_40 [2] : vector<4x4x128xf32> to vector<4x4xf32>
    %105 = vector.shape_cast %104 : vector<4x4xf32> to vector<4x4x1xf32>
    %cst_41 = arith.constant dense<0.000000e+00> : vector<4x1xf32>
    %106 = vector.multi_reduction <add>, %105, %cst_41 [1] : vector<4x4x1xf32> to vector<4x1xf32>
    %107 = vector.shape_cast %106 : vector<4x1xf32> to vector<4x1x1xf32>
    %c0_42 = arith.constant 0 : index
    %c0_43 = arith.constant 0 : index
    %c0_44 = arith.constant 0 : index
    %108 = vector.load %arg5[%c0_42, %c0_43, %c0_44] : memref<4x1x1xf32, #tpu.memory_space<vmem>>, vector<4x1x1xf32>
    %109 = arith.addf %108, %107 : vector<4x1x1xf32>
    %c0_45 = arith.constant 0 : index
    %c0_46 = arith.constant 0 : index
    %c0_47 = arith.constant 0 : index
    %110 = vector.load %arg5[%c0_45, %c0_46, %c0_47] : memref<4x1x1xf32, #tpu.memory_space<vmem>>, vector<4x1x1xf32>
    tpu.vector_store %arg5[%c0_45, %c0_46, %c0_47], %109 {strides = array<i32>} : memref<4x1x1xf32, #tpu.memory_space<vmem>>, vector<4x1x1xf32>,
    %111 = vector.extract_strided_slice %69 {offsets = [0, 3, 127], sizes = [4, 1, 1], strides = [1, 1, 1]} : vector<4x4x128xf32> to vector<4x1x1xf32>
    %c0_48 = arith.constant 0 : index
    %c0_49 = arith.constant 0 : index
    %c0_50 = arith.constant 0 : index
    %112 = vector.load %arg6[%c0_48, %c0_49, %c0_50] : memref<4x1x1xf32, #tpu.memory_space<vmem>>, vector<4x1x1xf32>
    tpu.vector_store %arg6[%c0_48, %c0_49, %c0_50], %111 {strides = array<i32>} : memref<4x1x1xf32, #tpu.memory_space<vmem>>, vector<4x1x1xf32>,
    %113 = vector.extract_strided_slice %87 {offsets = [0, 3, 127], sizes = [4, 1, 1], strides = [1, 1, 1]} : vector<4x4x128xf32> to vector<4x1x1xf32>
    %c0_51 = arith.constant 0 : index
    %c0_52 = arith.constant 0 : index
    %c0_53 = arith.constant 0 : index
    %114 = vector.load %arg7[%c0_51, %c0_52, %c0_53] : memref<4x1x1xf32, #tpu.memory_space<vmem>>, vector<4x1x1xf32>
    tpu.vector_store %arg7[%c0_51, %c0_52, %c0_53], %113 {strides = array<i32>} : memref<4x1x1xf32, #tpu.memory_space<vmem>>, vector<4x1x1xf32>,
    return
  }
  func.func @transform_0(%arg0: i32, %arg1: i32) -> (i32, i32, i32) {
    %c0_i32 = arith.constant 0 : i32
    %c0_i32_0 = arith.constant 0 : i32
    %c0_i32_1 = arith.constant 0 : i32
    return %arg0, %c0_i32, %c0_i32_0 : i32, i32, i32
  }
  func.func @transform_1(%arg0: i32, %arg1: i32) -> (i32, i32, i32) {
    %c0_i32 = arith.constant 0 : i32
    %c0_i32_0 = arith.constant 0 : i32
    return %arg0, %arg1, %c0_i32 : i32, i32, i32
  }
  func.func @transform_2(%arg0: i32, %arg1: i32) -> (i32, i32, i32) {
    %c0_i32 = arith.constant 0 : i32
    %c0_i32_0 = arith.constant 0 : i32
    return %arg0, %arg1, %c0_i32 : i32, i32, i32
  }
  func.func @transform_3(%arg0: i32, %arg1: i32) -> (i32, i32, i32) {
    %c0_i32 = arith.constant 0 : i32
    %c0_i32_0 = arith.constant 0 : i32
    %c0_i32_1 = arith.constant 0 : i32
    return %arg0, %c0_i32, %c0_i32_0 : i32, i32, i32
  }
}

</mosaic_0001>

<bundles_post_ra>
// kernel: tpu_custom_call.1
= control target key start
LH: loop header
LB: loop body
LE: loop exit
PB: predicated region body
PF: predicated region fallthrough
CT: control target
= control target key end

     0   :  { %8 = vsyncpa [#allocation5], 0  ;;  %s1268_s0 = inlined_call_operand.hbm [shape: f32[4,1,1], index: 0, kind: input, shape index: {}]   ;;  %s1269_s1 = inlined_call_operand.hbm [shape: f32[4,4,128], index: 1, kind: input, shape index: {}]   ;;  %s1270_s2 = inlined_call_operand.hbm [shape: s8[4,4,128], index: 2, kind: input, shape index: {}]   ;;  %s1271_s3 = inlined_call_operand.hbm [shape: f32[4,1,1], index: 3, kind: output, shape index: {}]  }
   0x1   :  { %9 = vsyncpa [#allocation8], 0 }
   0x2   :  { %10 = vsyncpa [#allocation6], 0  ;;  %s921_s12 = smov [#allocation7]   ;;  %s827_s16 = scalar_lea.hbm %s1269_s1, 256 }
   0x3   :  { %s28_s13 = sshll.u32 %s921_s12, 4  ;;  %p828_p0 = scmp.ne.s32.totalorder %s1269_s1, %s827_s16  ;;  %s29_s13 = int_to_ptr.vmem [resolvable:$true] %s28_s13 }
   0x4   :  { %p831_p1 = scmp.lt.u32.totalorder %s827_s16, %s1269_s1 }
   0x6   :  { %p833_p2 = pnand %p831_p1, %p828_p0 }
   0x8   :  { %836 = shalt.err (!%p833_p2)
}
   0x9   :  { %s837_s21 = scalar_lea.vmem %s29_s13, 256  ;;  %p842_p4 = scmp.lt.s32.totalorder %s29_s13, %s29_s13 }
   0xa   :  { %p838_p3 = scmp.ne.s32.totalorder %s29_s13, %s837_s21  ;;  %p843_p5 = scmp.lt.s32.totalorder %s837_s21, %s837_s21 }
   0xc   :  { %p844_p6 = por %p843_p5, %p842_p4 }
   0xe   :  { %p845_p7 = pnand %p844_p6, %p838_p3 }
  0x10   :  { %848 = shalt.err (!%p845_p7)
}
  0x11   :  { %s922_s22 = smov 64   ;;  %s923_s23 = smov 4  }
  0x12   :  { %34 = dma.hbm_to_vmem [thread:$0]  %s1269_s1, 256, %s29_s13, [#allocation8], %s922_s22, %s922_s22, %s923_s23  }
  0x13   :  { %s924_s26 = smov [#allocation4]   ;;  %s849_s30 = scalar_lea.hbm %s1268_s0, 64 }
  0x14   :  { %s16_s27 = sshll.u32 %s924_s26, 4  ;;  %p850_p8 = scmp.ne.s32.totalorder %s1268_s0, %s849_s30  ;;  %s17_s27 = int_to_ptr.vmem [resolvable:$true] %s16_s27 }
  0x15   :  { %p853_p9 = scmp.lt.u32.totalorder %s849_s30, %s1268_s0 }
  0x17   :  { %p855_p10 = pnand %p853_p9, %p850_p8 }
  0x19   :  { %858 = shalt.err (!%p855_p10)
}
  0x1a   :  { %s859_s8 = scalar_lea.vmem %s17_s27, 64  ;;  %p864_p12 = scmp.lt.s32.totalorder %s17_s27, %s17_s27 }
  0x1b   :  { %p860_p11 = scmp.ne.s32.totalorder %s17_s27, %s859_s8  ;;  %p865_p13 = scmp.lt.s32.totalorder %s859_s8, %s859_s8 }
  0x1d   :  { %p866_p0 = por %p865_p13, %p864_p12 }
  0x1f   :  { %p867_p1 = pnand %p866_p0, %p860_p11 }
  0x21   :  { %870 = shalt.err (!%p867_p1)
}
  0x22   :  { %s925_s1 = smov 16   ;;  %s926_s9 = smov 1  }
  0x23   :  { %22 = dma.hbm_to_vmem [thread:$0]  %s1268_s0, 64, %s17_s27, [#allocation5], %s925_s1, %s925_s1, %s926_s9  }
  0x24   :  { %s927_s12 = smov [#allocation9]   ;;  %s871_s16 = scalar_lea.hbm %s1270_s2, 64 }
  0x25   :  { %s40_s13 = sshll.u32 %s927_s12, 4  ;;  %p872_p2 = scmp.ne.s32.totalorder %s1270_s2, %s871_s16  ;;  %s41_s13 = int_to_ptr.vmem [resolvable:$true] %s40_s13 }
  0x26   :  { %p875_p3 = scmp.lt.u32.totalorder %s871_s16, %s1270_s2 }
  0x28   :  { %p877_p4 = pnand %p875_p3, %p872_p2 }
  0x2a   :  { %880 = shalt.err (!%p877_p4)
}
  0x2b   :  { %s881_s21 = scalar_lea.vmem %s41_s13, 64  ;;  %p886_p6 = scmp.lt.s32.totalorder %s41_s13, %s41_s13 }
  0x2c   :  { %p882_p5 = scmp.ne.s32.totalorder %s41_s13, %s881_s21  ;;  %p887_p7 = scmp.lt.s32.totalorder %s881_s21, %s881_s21 }
  0x2e   :  { %p888_p8 = por %p887_p7, %p886_p6 }
  0x30   :  { %p889_p9 = pnand %p888_p8, %p882_p5 }
  0x32   :  { %892 = shalt.err (!%p889_p9)
}
  0x33   :  { %46 = dma.hbm_to_vmem [thread:$0]  %s1270_s2, 64, %s41_s13, [#allocation8], %s925_s1, %s925_s1, %s926_s9  }
  0x34   :  { %915 = dma.done.wait [#allocation5], 64  }
  0x35   :  { %916 = vsyncadd [#allocation5], 4294967232 }
  0x36   :  { %917 = dma.done.wait [#allocation8], 320  }
  0x37   :  { %918 = vsyncadd [#allocation8], 4294966976  ;;  %v77_v0 = vld [vmem:[#allocation9] sm:$0x1]  ;;  %v79_v1 = vld [vmem:[#allocation9 + $0x2] sm:$0x1]  ;;  %v89_v12 = vlaneseq }
  0x38   :  { %v78_v2 = vld [vmem:[#allocation9 + $0x1] sm:$0x1]  ;;  %v81_v3 = vunpack.c.0.s8 %v77_v0  ;;  %v83_v4 = vunpack.c.0.s8 %v79_v1  ;;  %v80_v6 = vld [vmem:[#allocation9 + $0x3] sm:$0x1]  ;;  %s928_s2 = smov 2   ;;  %s929_s25 = smov 8  }
  0x39   :  { %v82_v5 = vunpack.c.0.s8 %v78_v2  ;;  %v84_v7 = vunpack.c.0.s8 %v80_v6  ;;  %v1007_v13 = vand.u32 127, %v89_v12  ;;  %vm228_vm7 = vcmask 1047556   ;;  %s936_s26 = smov [#allocation10]  }
  0x3a   :  { %v85_v8 = vcvt.s32.f32 %v81_v3  ;;  %v87_v9 = vcvt.s32.f32 %v83_v4  ;;  %vm60_vm9 = vcmask 0   ;;  %vm644_vm13 = vcmask 1043456   ;;  %s772_s27 = sshll.u32 %s936_s26, 4  ;;  %s773_s27 = int_to_ptr.vmem [resolvable:$true] %s772_s27 }
  0x3b   :  { %v86_v10 = vcvt.s32.f32 %v82_v5  ;;  %v88_v11 = vcvt.s32.f32 %v84_v7  ;;  %vm101_vm0 = vcmp.ge.s32.totalorder %v1007_v13, 1  ;;  %vm118_vm1 = vcmp.ge.s32.totalorder %v1007_v13, 2  ;;  %s893_s28 = scalar_lea.vmem %s773_s27, 64  ;;  %p898_p11 = scmp.lt.s32.totalorder %s773_s27, %s773_s27 }
  0x3c   :  { %93 = vrot.lane.b32.xlu0 %v85_v8, %s926_s9  ;;  %97 = vrot.lane.b32.xlu1 %v87_v9, %s926_s9  ;;  %vm135_vm2 = vcmp.ge.s32.totalorder %v1007_v13, 4  ;;  %vm152_vm3 = vcmp.ge.s32.totalorder %v1007_v13, 8  ;;  %vm169_vm4 = vcmp.ge.s32.totalorder %v1007_v13, 16  ;;  %vm186_vm5 = vcmp.ge.s32.totalorder %v1007_v13, 32  ;;  %p894_p10 = scmp.ne.s32.totalorder %s773_s27, %s893_s28  ;;  %p899_p12 = scmp.lt.s32.totalorder %s893_s28, %s893_s28 }
  0x3d   :  { %vm203_vm6 = vcmp.ge.s32.totalorder %v1007_v13, 64  ;;  %vm631_vm12 = vcmp.eq.s32.totalorder %v1007_v13, 0  ;;  %vm730_vm14 = vcmask 3075  }
  0x3e   :  { %p900_p13 = por %p899_p12, %p898_p11 }
  0x40   :  { %95 = vrot.lane.b32.xlu0 %v86_v10, %s926_s9  ;;  %99 = vrot.lane.b32.xlu1 %v88_v11, %s926_s9  ;;  %p901_p0 = pnand %p900_p13, %p894_p10 }
  0xae   :  { %v94_v14 = vpop.permute.xlu0 %93  ;;  %v98_v15 = vpop.permute.xlu1 %97 }
  0xaf   :  { %v102_v16 = vsel %vm101_vm0, %v94_v14, 0.0  ;;  %v104_v17 = vsel %vm101_vm0, %v98_v15, 0.0 }
  0xb0   :  { %v106_v18 = vadd.f32 %v102_v16, %v85_v8  ;;  %v108_v19 = vadd.f32 %v104_v17, %v87_v9 }
  0xb2   :  { %110 = vrot.lane.b32.xlu0 %v106_v18, %s928_s2  ;;  %v96_v20 = vpop.permute.xlu0 %95  ;;  %v100_v21 = vpop.permute.xlu1 %99 }
  0xb3   :  { %v103_v22 = vsel %vm101_vm0, %v96_v20, 0.0  ;;  %v105_v23 = vsel %vm101_vm0, %v100_v21, 0.0 }
  0xb4   :  { %v107_v24 = vadd.f32 %v103_v22, %v86_v10  ;;  %v109_v25 = vadd.f32 %v105_v23, %v88_v11 }
  0xb6   :  { %114 = vrot.lane.b32.xlu0 %v108_v19, %s928_s2  ;;  %112 = vrot.lane.b32.xlu1 %v107_v24, %s928_s2 }
  0xba   :  { %116 = vrot.lane.b32.xlu1 %v109_v25, %s928_s2 }
 0x124   :  { %v111_v26 = vpop.permute.xlu0 %110 }
 0x125   :  { %v119_v27 = vsel %vm118_vm1, %v111_v26, 0.0 }
 0x126   :  { %v123_v28 = vadd.f32 %v119_v27, %v106_v18 }
 0x128   :  { %v113_v29 = vpop.permute.xlu1 %112  ;;  %127 = vrot.lane.b32.xlu0 %v123_v28, %s923_s23  ;;  %v115_v30 = vpop.permute.xlu0 %114 }
 0x129   :  { %v120_v31 = vsel %vm118_vm1, %v113_v29, 0.0  ;;  %v121_v32 = vsel %vm118_vm1, %v115_v30, 0.0 }
 0x12a   :  { %v124_v33 = vadd.f32 %v120_v31, %v107_v24  ;;  %v125_v34 = vadd.f32 %v121_v32, %v108_v19 }
 0x12c   :  { %129 = vrot.lane.b32.xlu1 %v124_v33, %s923_s23  ;;  %v117_v35 = vpop.permute.xlu1 %116  ;;  %131 = vrot.lane.b32.xlu0 %v125_v34, %s923_s23 }
 0x12d   :  { %v122_v36 = vsel %vm118_vm1, %v117_v35, 0.0 }
 0x12e   :  { %v126_v37 = vadd.f32 %v122_v36, %v109_v25 }
 0x130   :  { %133 = vrot.lane.b32.xlu1 %v126_v37, %s923_s23  ;;  %s930_s23 = smov 32  }
 0x19a   :  { %v128_v38 = vpop.permute.xlu0 %127 }
 0x19b   :  { %v136_v39 = vsel %vm135_vm2, %v128_v38, 0.0  ;;  %v1045_v38 = vshrl.u32 %v89_v12, 7 }
 0x19c   :  { %v140_v40 = vadd.f32 %v136_v39, %v123_v28 }
 0x19d   :  { %vm245_vm8 = vcmp.ge.s32.totalorder %v1045_v38, 1  ;;  %vm314_vm10 = vcmp.ge.s32.totalorder %v1045_v38, 2  ;;  %vm562_vm11 = vcmp.eq.s32.totalorder %v1045_v38, 0 }
 0x19e   :  { %v130_v41 = vpop.permute.xlu1 %129  ;;  %144 = vrot.lane.b32.xlu0 %v140_v40, %s929_s25  ;;  %v132_v42 = vpop.permute.xlu0 %131 }
 0x19f   :  { %v137_v43 = vsel %vm135_vm2, %v130_v41, 0.0  ;;  %v138_v44 = vsel %vm135_vm2, %v132_v42, 0.0 }
 0x1a0   :  { %v141_v45 = vadd.f32 %v137_v43, %v124_v33  ;;  %v142_v46 = vadd.f32 %v138_v44, %v125_v34 }
 0x1a2   :  { %146 = vrot.lane.b32.xlu1 %v141_v45, %s929_s25  ;;  %v134_v47 = vpop.permute.xlu1 %133  ;;  %148 = vrot.lane.b32.xlu0 %v142_v46, %s929_s25 }
 0x1a3   :  { %v139_v48 = vsel %vm135_vm2, %v134_v47, 0.0 }
 0x1a4   :  { %v143_v49 = vadd.f32 %v139_v48, %v126_v37 }
 0x1a6   :  { %150 = vrot.lane.b32.xlu1 %v143_v49, %s929_s25 }
 0x210   :  { %v145_v50 = vpop.permute.xlu0 %144 }
 0x211   :  { %v153_v51 = vsel %vm152_vm3, %v145_v50, 0.0 }
 0x212   :  { %v157_v52 = vadd.f32 %v153_v51, %v140_v40 }
 0x214   :  { %v147_v53 = vpop.permute.xlu1 %146  ;;  %161 = vrot.lane.b32.xlu0 %v157_v52, %s925_s1  ;;  %v149_v54 = vpop.permute.xlu0 %148 }
 0x215   :  { %v154_v55 = vsel %vm152_vm3, %v147_v53, 0.0  ;;  %v155_v56 = vsel %vm152_vm3, %v149_v54, 0.0 }
 0x216   :  { %v158_v57 = vadd.f32 %v154_v55, %v141_v45  ;;  %v159_v58 = vadd.f32 %v155_v56, %v142_v46 }
 0x218   :  { %163 = vrot.lane.b32.xlu1 %v158_v57, %s925_s1  ;;  %v151_v59 = vpop.permute.xlu1 %150  ;;  %165 = vrot.lane.b32.xlu0 %v159_v58, %s925_s1 }
 0x219   :  { %v156_v60 = vsel %vm152_vm3, %v151_v59, 0.0 }
 0x21a   :  { %v160_v61 = vadd.f32 %v156_v60, %v143_v49 }
 0x21c   :  { %167 = vrot.lane.b32.xlu1 %v160_v61, %s925_s1 }
 0x286   :  { %v162_v62 = vpop.permute.xlu0 %161 }
 0x287   :  { %v170_v63 = vsel %vm169_vm4, %v162_v62, 0.0 }
 0x288   :  { %v174_v0 = vadd.f32 %v170_v63, %v157_v52 }
 0x28a   :  { %v164_v1 = vpop.permute.xlu1 %163  ;;  %178 = vrot.lane.b32.xlu0 %v174_v0, %s930_s23  ;;  %v166_v2 = vpop.permute.xlu0 %165 }
 0x28b   :  { %v171_v3 = vsel %vm169_vm4, %v164_v1, 0.0  ;;  %v172_v4 = vsel %vm169_vm4, %v166_v2, 0.0 }
 0x28c   :  { %v175_v5 = vadd.f32 %v171_v3, %v158_v57  ;;  %v176_v6 = vadd.f32 %v172_v4, %v159_v58 }
 0x28e   :  { %180 = vrot.lane.b32.xlu1 %v175_v5, %s930_s23  ;;  %v168_v7 = vpop.permute.xlu1 %167  ;;  %182 = vrot.lane.b32.xlu0 %v176_v6, %s930_s23 }
 0x28f   :  { %v173_v8 = vsel %vm169_vm4, %v168_v7, 0.0  ;;  %v932_v7 = vmov 0  }
 0x290   :  { %v177_v9 = vadd.f32 %v173_v8, %v160_v61  ;;  %813 = vset.pattern.permute.xlu1 %v932_v7  ;;  %v933_v8 = vmov 0.0   ;;  %814 = vset.pattern.permute.xlu0 %v932_v7 }
 0x291   :  { %61 = vst.msk [vmem:[#allocation2] sm:$0x1] %vm60_vm9, %v933_v8  ;;  %62 = vst.msk [vmem:[#allocation2 + $0x1] sm:$0x1] %vm60_vm9, %v933_v8 }
 0x292   :  { %184 = vrot.lane.b32.xlu1 %v177_v9, %s930_s23  ;;  %63 = vst.msk [vmem:[#allocation2 + $0x2] sm:$0x1] %vm60_vm9, %v933_v8  ;;  %64 = vst.msk [vmem:[#allocation2 + $0x3] sm:$0x1] %vm60_vm9, %v933_v8 }
 0x293   :  { %65 = vst.msk [vmem:[#allocation3] sm:$0x1] %vm60_vm9, %v933_v8  ;;  %66 = vst.msk [vmem:[#allocation3 + $0x1] sm:$0x1] %vm60_vm9, %v933_v8 }
 0x294   :  { %67 = vst.msk [vmem:[#allocation3 + $0x2] sm:$0x1] %vm60_vm9, %v933_v8  ;;  %68 = vst.msk [vmem:[#allocation3 + $0x3] sm:$0x1] %vm60_vm9, %v933_v8 }
 0x295   :  { %69 = vst.msk [vmem:[#allocation10] sm:$0x1] %vm60_vm9, %v933_v8  ;;  %70 = vst.msk [vmem:[#allocation10 + $0x1] sm:$0x1] %vm60_vm9, %v933_v8 }
 0x296   :  { %71 = vst.msk [vmem:[#allocation10 + $0x2] sm:$0x1] %vm60_vm9, %v933_v8  ;;  %72 = vst.msk [vmem:[#allocation10 + $0x3] sm:$0x1] %vm60_vm9, %v933_v8 }
 0x2fc   :  { %v179_v10 = vpop.permute.xlu0 %178 }
 0x2fd   :  { %v187_v11 = vsel %vm186_vm5, %v179_v10, 0.0 }
 0x2fe   :  { %v191_v14 = vadd.f32 %v187_v11, %v174_v0 }
 0x300   :  { %v181_v15 = vpop.permute.xlu1 %180  ;;  %195 = vrot.lane.b32.xlu0 %v191_v14, %s922_s22  ;;  %v183_v16 = vpop.permute.xlu0 %182 }
 0x301   :  { %v188_v17 = vsel %vm186_vm5, %v181_v15, 0.0  ;;  %v189_v18 = vsel %vm186_vm5, %v183_v16, 0.0 }
 0x302   :  { %v192_v19 = vadd.f32 %v188_v17, %v175_v5  ;;  %v193_v20 = vadd.f32 %v189_v18, %v176_v6 }
 0x304   :  { %197 = vrot.lane.b32.xlu1 %v192_v19, %s922_s22  ;;  %v185_v21 = vpop.permute.xlu1 %184  ;;  %199 = vrot.lane.b32.xlu0 %v193_v20, %s922_s22 }
 0x305   :  { %v190_v22 = vsel %vm186_vm5, %v185_v21, 0.0 }
 0x306   :  { %v194_v23 = vadd.f32 %v190_v22, %v177_v9 }
 0x308   :  { %201 = vrot.lane.b32.xlu1 %v194_v23, %s922_s22  ;;  %s931_s22 = smov 127  }
 0x372   :  { %v196_v24 = vpop.permute.xlu0 %195 }
 0x373   :  { %v204_v25 = vsel %vm203_vm6, %v196_v24, 0.0 }
 0x374   :  { %v1028_v26 = vadd.f32 %v204_v25, %v191_v14 }
 0x376   :  { %v198_v27 = vpop.permute.xlu1 %197  ;;  %216 = vrot.lane.b32.xlu0 %v1028_v26, %s926_s9  ;;  %v200_v28 = vpop.permute.xlu0 %199 }
 0x377   :  { %v205_v29 = vsel %vm203_vm6, %v198_v27, 0.0  ;;  %v206_v30 = vsel %vm203_vm6, %v200_v28, 0.0 }
 0x378   :  { %v1032_v31 = vadd.f32 %v205_v29, %v192_v19  ;;  %v1034_v32 = vadd.f32 %v206_v30, %v193_v20 }
 0x37a   :  { %218 = vrot.lane.b32.xlu1 %v1032_v31, %s926_s9  ;;  %v202_v33 = vpop.permute.xlu1 %201  ;;  %220 = vrot.lane.b32.xlu0 %v1034_v32, %s926_s9 }
 0x37b   :  { %v207_v34 = vsel %vm203_vm6, %v202_v33, 0.0 }
 0x37c   :  { %v1040_v35 = vadd.f32 %v207_v34, %v194_v23 }
 0x37e   :  { %222 = vrot.lane.b32.xlu1 %v1040_v35, %s926_s9 }
 0x3e8   :  { %v217_v36 = vpop.permute.xlu0 %216 }
 0x3e9   :  { %v229_v37 = vrot.slane %v217_v36, 4 }
 0x3eb   :  { %v230_v39 = vsel %vm228_vm7, %v229_v37, %v217_v36 }
 0x3ec   :  { %v237_v40 = vrot.slane %v230_v39, 4  ;;  %v219_v41 = vpop.permute.xlu1 %218  ;;  %v221_v42 = vpop.permute.xlu0 %220 }
 0x3ed   :  { %v231_v43 = vrot.slane %v219_v41, 4  ;;  %v233_v44 = vrot.slane %v221_v42, 4 }
 0x3ee   :  { %v241_v45 = vsel %vm228_vm7, %v237_v40, %v217_v36 }
 0x3ef   :  { %v232_v46 = vsel %vm228_vm7, %v231_v43, %v219_v41  ;;  %v234_v47 = vsel %vm228_vm7, %v233_v44, %v221_v42  ;;  %v250_v48 = vrot.slane %v241_v45, 3  ;;  %v786_v44 = vld [vmem:[#allocation2 + $0x1] ss:$0 sm:$0xff] }
 0x3f0   :  { %v238_v49 = vrot.slane %v232_v46, 4  ;;  %v239_v50 = vrot.slane %v234_v47, 4  ;;  %v223_v12 = vpop.permute.xlu1 %222  ;;  %v785_v46 = vld [vmem:[#allocation2] ss:$0 sm:$0xff]  ;;  %v789_v47 = vld [vmem:[#allocation4] ss:$0 sm:$0xff] }
 0x3f1   :  { %v235_v51 = vrot.slane %v223_v12, 4  ;;  %v258_v52 = vsel %vm245_vm8, %v250_v48, 0.0  ;;  %v787_v48 = vld [vmem:[#allocation2 + $0x2] ss:$0 sm:$0xff] }
 0x3f2   :  { %v242_v53 = vsel %vm228_vm7, %v238_v49, %v219_v41  ;;  %v243_v54 = vsel %vm228_vm7, %v239_v50, %v221_v42  ;;  %266 = vrot.lane.b32.xlu0 %v258_v52, %s931_s22  ;;  %v934_v49 = vmov 127   ;;  %v788_v50 = vld [vmem:[#allocation2 + $0x3] ss:$0 sm:$0xff] }
 0x3f3   :  { %v236_v55 = vsel %vm228_vm7, %v235_v51, %v223_v12  ;;  %v251_v56 = vrot.slane %v242_v53, 3  ;;  %v252_v57 = vrot.slane %v243_v54, 3 }
 0x3f4   :  { %v240_v58 = vrot.slane %v236_v55, 4 }
 0x3f5   :  { %v259_v59 = vsel %vm245_vm8, %v251_v56, 0.0  ;;  %v260_v60 = vsel %vm245_vm8, %v252_v57, 0.0 }
 0x3f6   :  { %v244_v61 = vsel %vm228_vm7, %v240_v58, %v223_v12  ;;  %268 = vrot.lane.b32.xlu1 %v259_v59, %s931_s22  ;;  %270 = vrot.lane.b32.xlu0 %v260_v60, %s931_s22 }
 0x3f7   :  { %v253_v62 = vrot.slane %v244_v61, 3 }
 0x3f9   :  { %v261_v63 = vsel %vm245_vm8, %v253_v62, 0.0  ;;  %v790_v62 = vld [vmem:[#allocation4 + $0x1] ss:$0 sm:$0xff] }
 0x3fa   :  { %272 = vrot.lane.b32.xlu1 %v261_v63, %s931_s22  ;;  %v791_v63 = vld [vmem:[#allocation4 + $0x2] ss:$0 sm:$0xff] }
 0x464   :  { %v267_v0 = vpop.permute.xlu0 %266 }
 0x465   :  { %v1069_v1 = vadd.f32 %v267_v0, %v1028_v26  ;;  %v792_v0 = vld [vmem:[#allocation4 + $0x3] ss:$0 sm:$0xff] }
 0x467   :  { %286 = vrot.lane.b32.xlu0 %v1069_v1, %s926_s9 }
 0x468   :  { %v269_v2 = vpop.permute.xlu1 %268  ;;  %v271_v3 = vpop.permute.xlu0 %270 }
 0x469   :  { %v1074_v4 = vadd.f32 %v269_v2, %v1032_v31  ;;  %v1077_v5 = vadd.f32 %v271_v3, %v1034_v32  ;;  %v935_v3 = vmov 839922192  }
 0x46b   :  { %288 = vrot.lane.b32.xlu1 %v1074_v4, %s926_s9  ;;  %290 = vrot.lane.b32.xlu0 %v1077_v5, %s926_s9 }
 0x46c   :  { %v273_v6 = vpop.permute.xlu1 %272 }
 0x46d   :  { %v281_v9 = vadd.f32 %v273_v6, %v1040_v35 }
 0x46f   :  { %292 = vrot.lane.b32.xlu1 %v281_v9, %s926_s9 }
 0x4d9   :  { %v287_v10 = vpop.permute.xlu0 %286 }
 0x4da   :  { %v298_v11 = vrot.slane %v287_v10, 4 }
 0x4dc   :  { %v299_v14 = vsel %vm228_vm7, %v298_v11, %v287_v10 }
 0x4dd   :  { %v306_v15 = vrot.slane %v299_v14, 4  ;;  %v289_v16 = vpop.permute.xlu1 %288  ;;  %v291_v17 = vpop.permute.xlu0 %290 }
 0x4de   :  { %v300_v18 = vrot.slane %v289_v16, 4  ;;  %v302_v19 = vrot.slane %v291_v17, 4 }
 0x4df   :  { %v310_v20 = vsel %vm228_vm7, %v306_v15, %v287_v10 }
 0x4e0   :  { %v301_v21 = vsel %vm228_vm7, %v300_v18, %v289_v16  ;;  %v303_v22 = vsel %vm228_vm7, %v302_v19, %v291_v17  ;;  %v319_v23 = vrot.slane %v310_v20, 2 }
 0x4e1   :  { %v307_v24 = vrot.slane %v301_v21, 4  ;;  %v308_v25 = vrot.slane %v303_v22, 4  ;;  %v293_v27 = vpop.permute.xlu1 %292 }
 0x4e2   :  { %v304_v28 = vrot.slane %v293_v27, 4  ;;  %v327_v29 = vsel %vm314_vm10, %v319_v23, 0.0 }
 0x4e3   :  { %v311_v30 = vsel %vm228_vm7, %v307_v24, %v289_v16  ;;  %v312_v33 = vsel %vm228_vm7, %v308_v25, %v291_v17  ;;  %335 = vrot.lane.b32.xlu0 %v327_v29, %s931_s22 }
 0x4e4   :  { %v305_v34 = vsel %vm228_vm7, %v304_v28, %v293_v27  ;;  %v320_v36 = vrot.slane %v311_v30, 2  ;;  %v321_v37 = vrot.slane %v312_v33, 2 }
 0x4e5   :  { %v309_v39 = vrot.slane %v305_v34, 4 }
 0x4e6   :  { %v328_v40 = vsel %vm314_vm10, %v320_v36, 0.0  ;;  %v329_v41 = vsel %vm314_vm10, %v321_v37, 0.0 }
 0x4e7   :  { %v313_v42 = vsel %vm228_vm7, %v309_v39, %v293_v27  ;;  %337 = vrot.lane.b32.xlu1 %v328_v40, %s931_s22  ;;  %339 = vrot.lane.b32.xlu0 %v329_v41, %s931_s22 }
 0x4e8   :  { %v322_v43 = vrot.slane %v313_v42, 2 }
 0x4ea   :  { %v330_v45 = vsel %vm314_vm10, %v322_v43, 0.0 }
 0x4eb   :  { %341 = vrot.lane.b32.xlu1 %v330_v45, %s931_s22  ;;  %436 = vperm.xlu0 %814, %v786_v44  }
 0x4ef   :  { %432 = vperm.xlu1 %813, %v785_v46   ;;  %483 = vperm.xlu0 %814, %v789_v47  }
 0x4f3   :  { %440 = vperm.xlu1 %813, %v787_v48   ;;  %815 = vset.pattern.permute.xlu0 %v934_v49 }
 0x4f7   :  { %444 = vperm.xlu1 %813, %v788_v50  }
 0x4fb   :  { %816 = vset.pattern.permute.xlu1 %v934_v49 }
 0x555   :  { %v336_v12 = vpop.permute.xlu0 %335 }
 0x556   :  { %v347_v51 = vadd.f32 %v336_v12, %v1069_v1 }
 0x558   :  { %v351_v52 = vsub.f32 %v347_v51, %v1028_v26 }
 0x559   :  { %v338_v53 = vpop.permute.xlu1 %337  ;;  %v340_v54 = vpop.permute.xlu0 %339 }
 0x55a   :  { %v348_v55 = vadd.f32 %v338_v53, %v1074_v4  ;;  %357 = vperm.xlu0 %815, %v351_v52   ;;  %v349_v57 = vadd.f32 %v340_v54, %v1077_v5  ;;  %v361_v4 = vunpack.c.l.s4 %v935_v3  ;;  %v452_v5 = vmul.u32 128, %v1045_v38 }
 0x55c   :  { %v352_v56 = vsub.f32 %v348_v55, %v1032_v31  ;;  %v353_v60 = vsub.f32 %v349_v57, %v1034_v32  ;;  %v362_v6 = vunpack.c.0.s8 %v361_v4  ;;  %v455_v10 = vadd.s32 %v452_v5, %v1007_v13 }
 0x55d   :  { %v342_v58 = vpop.permute.xlu1 %341 }
 0x55e   :  { %v350_v59 = vadd.f32 %v342_v58, %v281_v9  ;;  %369 = vperm.xlu1 %816, %v352_v56   ;;  %v365_v11 = vsub.s32 %v362_v6, %v1045_v38  ;;  %v456_v14 = vadd.s32 1, %v455_v10 }
 0x560   :  { %v354_v61 = vsub.f32 %v350_v59, %v1040_v35  ;;  %v457_v17 = vcvt.s32.f32 %v456_v14  ;;  %v793_v59 = vld [vmem:[#allocation3] ss:$0 sm:$0xff] }
 0x562   :  { %393 = vperm.xlu0 %815, %v354_v61   ;;  %381 = vperm.xlu1 %816, %v353_v60   ;;  %v794_v60 = vld [vmem:[#allocation3 + $0x1] ss:$0 sm:$0xff]  ;;  %v795_v61 = vld [vmem:[#allocation3 + $0x2] ss:$0 sm:$0xff] }
 0x566   :  { %817 = vset.pattern.permute.xlu1 %v932_v7  ;;  %818 = vset.pattern.permute.xlu0 %v932_v7 }
 0x567   :  { %487 = vperm.xlu1 %817, %v790_v62   ;;  %491 = vperm.xlu0 %818, %v791_v63  }
 0x56a   :  { %v437_v2 = vpop.permute.xlu0 %436 }
 0x56b   :  { %495 = vperm.xlu1 %817, %v792_v0  }
 0x56e   :  { %v433_v1 = vpop.permute.xlu1 %432  ;;  %v484_v9 = vpop.permute.xlu0 %483 }
 0x572   :  { %v441_v8 = vpop.permute.xlu1 %440 }
 0x576   :  { %v445_v15 = vpop.permute.xlu1 %444 }
 0x5d9   :  { %v358_v7 = vpop.permute.xlu0 %357 }
 0x5da   :  { %v366_v16 = vrot.slane %v358_v7, %v365_v11 }
 0x5dc   :  { %v403_v18 = vadd.f32 %v366_v16, %v1028_v26 }
 0x5dd   :  { %v370_v19 = vpop.permute.xlu1 %369 }
 0x5de   :  { %v1133_v20 = vadd.f32 %v433_v1, %v403_v18  ;;  %v378_v21 = vrot.slane %v370_v19, %v365_v11 }
 0x5e0   :  { %v502_v22 = vsub.f32 %v457_v17, %v1133_v20  ;;  %v404_v23 = vadd.f32 %v378_v21, %v1032_v31  ;;  %v796_v21 = vld [vmem:[#allocation3 + $0x3] ss:$0 sm:$0xff] }
 0x5e1   :  { %v394_v24 = vpop.permute.xlu0 %393  ;;  %v382_v25 = vpop.permute.xlu1 %381 }
 0x5e2   :  { %v506_v27 = vadd.f32 %v502_v22, %v484_v9  ;;  %v1137_v28 = vadd.f32 %v437_v2, %v404_v23  ;;  %v402_v29 = vrot.slane %v394_v24, %v365_v11  ;;  %v390_v30 = vrot.slane %v382_v25, %v365_v11 }
 0x5e3   :  { %v1181_v22 = vsub.s32 3, %v1045_v38 }
 0x5e4   :  { %819 = vrcp.f32 %v506_v27  ;;  %v406_v33 = vadd.f32 %v402_v29, %v1040_v35  ;;  %v405_v26 = vadd.f32 %v390_v30, %v1034_v32  ;;  %v503_v34 = vsub.f32 %v457_v17, %v1137_v28 }
 0x5e5   :  { %v498_v32 = vsub.f32 %v484_v9, %v1133_v20  ;;  %v709_v23 = vrot.slane %v1137_v28, %v1181_v22  ;;  %v705_v25 = vrot.slane %v1133_v20, %v1181_v22 }
 0x5e6   :  { %v1142_v36 = vadd.f32 %v445_v15, %v406_v33  ;;  %v1144_v37 = vadd.f32 %v441_v8, %v405_v26  ;;  %v488_v39 = vpop.permute.xlu1 %487  ;;  %v492_v42 = vpop.permute.xlu0 %491 }
 0x5e7   :  { %v507_v31 = vadd.f32 %v503_v34, %v488_v39  ;;  %v499_v48 = vsub.f32 %v488_v39, %v1137_v28 }
 0x5e8   :  { %v504_v40 = vsub.f32 %v457_v17, %v1144_v37  ;;  %v505_v41 = vsub.f32 %v457_v17, %v1142_v36  ;;  %v500_v12 = vsub.f32 %v492_v42, %v1144_v37  ;;  %v713_v27 = vrot.slane %v1144_v37, %v1181_v22 }
 0x5e9   :  { %821 = vrcp.f32 %v507_v31  ;;  %v717_v28 = vrot.slane %v1142_v36, %v1181_v22 }
 0x5ea   :  { %v508_v43 = vadd.f32 %v504_v40, %v492_v42  ;;  %v496_v44 = vpop.permute.xlu1 %495 }
 0x5eb   :  { %v509_v45 = vadd.f32 %v505_v41, %v496_v44  ;;  %v501_v53 = vsub.f32 %v496_v44, %v1142_v36 }
 0x5ec   :  { %823 = vrcp.f32 %v508_v43 }
 0x5ed   :  { %825 = vrcp.f32 %v509_v45  ;;  %v73_v45 = vld [vmem:[#allocation7] sm:$0xf] }
 0x5ee   :  { %v820_v35 = vpop.eup %819 }
 0x5ef   :  { %v511_v46 = vmul.f32 %v820_v35, %v498_v32 }
 0x5f1   :  { %v1149_v47 = vsub.f32 1.0, %v511_v46 }
 0x5f3   :  { %v822_v49 = vpop.eup %821  ;;  %534 = vrot.lane.b32.xlu0 %v1149_v47, %s926_s9  ;;  %v738_v24 = vrot.slane %v1149_v47, %v1181_v22 }
 0x5f4   :  { %v513_v50 = vmul.f32 %v822_v49, %v499_v48 }
 0x5f6   :  { %v824_v51 = vpop.eup %823  ;;  %v1155_v52 = vsub.f32 1.0, %v513_v50 }
 0x5f7   :  { %v826_v54 = vpop.eup %825  ;;  %v515_v55 = vmul.f32 %v824_v51, %v500_v12  ;;  %v75_v51 = vld [vmem:[#allocation7 + $0x8] sm:$0xf] }
 0x5f8   :  { %v517_v56 = vmul.f32 %v826_v54, %v501_v53  ;;  %536 = vrot.lane.b32.xlu1 %v1155_v52, %s926_s9  ;;  %v742_v29 = vrot.slane %v1155_v52, %v1181_v22 }
 0x5f9   :  { %v1160_v57 = vsub.f32 1.0, %v515_v55  ;;  %v74_v55 = vld [vmem:[#allocation7 + $0x4] sm:$0xf] }
 0x5fa   :  { %v1162_v58 = vsub.f32 1.0, %v517_v56 }
 0x5fb   :  { %538 = vrot.lane.b32.xlu0 %v1160_v57, %s926_s9 }
 0x5fc   :  { %540 = vrot.lane.b32.xlu1 %v1162_v58, %s926_s9 }
 0x5ff   :  { %588 = vperm.xlu0 %818, %v793_v59  }
 0x600   :  { %592 = vperm.xlu1 %817, %v794_v60  }
 0x603   :  { %596 = vperm.xlu0 %818, %v795_v61  }
 0x665   :  { %v535_v62 = vpop.permute.xlu0 %534 }
 0x666   :  { %v546_v63 = vrot.slane %v535_v62, 4 }
 0x668   :  { %v547_v0 = vsel %vm228_vm7, %v546_v63, %v535_v62 }
 0x669   :  { %v554_v1 = vrot.slane %v547_v0, 4 }
 0x66a   :  { %v537_v2 = vpop.permute.xlu1 %536 }
 0x66b   :  { %v548_v3 = vrot.slane %v537_v2, 4  ;;  %v558_v4 = vsel %vm228_vm7, %v554_v1, %v535_v62 }
 0x66c   :  { %605 = vperm.xlu0 %818, %v558_v4  }
 0x66d   :  { %v549_v5 = vsel %vm228_vm7, %v548_v3, %v537_v2  ;;  %v539_v6 = vpop.permute.xlu0 %538  ;;  %v76_v3 = vld [vmem:[#allocation7 + $0xc] sm:$0xf] }
 0x66e   :  { %v555_v8 = vrot.slane %v549_v5, 4  ;;  %v550_v9 = vrot.slane %v539_v6, 4  ;;  %v541_v10 = vpop.permute.xlu1 %540 }
 0x66f   :  { %v552_v11 = vrot.slane %v541_v10, 4 }
 0x670   :  { %v551_v14 = vsel %vm228_vm7, %v550_v9, %v539_v6  ;;  %v559_v15 = vsel %vm228_vm7, %v555_v8, %v537_v2 }
 0x671   :  { %v556_v7 = vrot.slane %v551_v14, 4  ;;  %v553_v16 = vsel %vm228_vm7, %v552_v11, %v541_v10  ;;  %609 = vperm.xlu1 %817, %v559_v15   ;;  %v750_v11 = vrot.slane %v1162_v58, %v1181_v22  ;;  %v746_v14 = vrot.slane %v1160_v57, %v1181_v22 }
 0x672   :  { %v557_v17 = vrot.slane %v553_v16, 4 }
 0x673   :  { %v560_v18 = vsel %vm228_vm7, %v556_v7, %v539_v6 }
 0x674   :  { %613 = vperm.xlu0 %818, %v560_v18   ;;  %v561_v19 = vsel %vm228_vm7, %v557_v17, %v541_v10 }
 0x675   :  { %617 = vperm.xlu1 %817, %v561_v19  }
 0x678   :  { %522 = vrot.lane.b32.xlu0 %v1149_v47, %s926_s9 }
 0x679   :  { %600 = vperm.xlu1 %817, %v796_v21  }
 0x67c   :  { %526 = vrot.lane.b32.xlu0 %v1160_v57, %s926_s9 }
 0x67d   :  { %524 = vrot.lane.b32.xlu1 %v1155_v52, %s926_s9 }
 0x67e   :  { %v589_v20 = vpop.permute.xlu0 %588 }
 0x67f   :  { %v593_v33 = vpop.permute.xlu1 %592 }
 0x680   :  { %720 = vrot.lane.b32.xlu0 %v709_v23, %s926_s9 }
 0x681   :  { %528 = vrot.lane.b32.xlu1 %v1162_v58, %s926_s9 }
 0x682   :  { %v597_v30 = vpop.permute.xlu0 %596 }
 0x684   :  { %751 = vrot.lane.b32.xlu0 %v738_v24, %s926_s9 }
 0x685   :  { %718 = vrot.lane.b32.xlu1 %v705_v25, %s926_s9 }
 0x689   :  { %722 = vrot.lane.b32.xlu1 %v713_v27, %s926_s9 }
 0x68d   :  { %724 = vrot.lane.b32.xlu1 %v717_v28, %s926_s9 }
 0x691   :  { %753 = vrot.lane.b32.xlu1 %v742_v29, %s926_s9 }
 0x6eb   :  { %v606_v26 = vpop.permute.xlu0 %605 }
 0x6ec   :  { %v619_v39 = vrot.slane %v606_v26, 3  ;;  %v685_v26 = vld [vmem:[#allocation10] sm:$0x1] }
 0x6ee   :  { %v627_v40 = vsel %vm562_vm11, %v589_v20, %v619_v39 }
 0x6f0   :  { %v610_v34 = vpop.permute.xlu1 %609 }
 0x6f1   :  { %v620_v42 = vrot.slane %v610_v34, 3 }
 0x6f3   :  { %v614_v31 = vpop.permute.xlu0 %613  ;;  %v628_v50 = vsel %vm562_vm11, %v593_v33, %v620_v42 }
 0x6f4   :  { %v618_v37 = vpop.permute.xlu1 %617  ;;  %v621_v36 = vrot.slane %v614_v31, 3 }
 0x6f5   :  { %v622_v56 = vrot.slane %v618_v37, 3 }
 0x6f6   :  { %v629_v35 = vsel %vm562_vm11, %v597_v30, %v621_v36 }
 0x6f7   :  { %v523_v41 = vpop.permute.xlu0 %522 }
 0x6f8   :  { %v632_v43 = vsel %vm631_vm12, %v627_v40, %v523_v41  ;;  %v601_v44 = vpop.permute.xlu1 %600 }
 0x6f9   :  { %v636_v32 = vsub.f32 %v1149_v47, %v632_v43  ;;  %v630_v62 = vsel %vm562_vm11, %v601_v44, %v622_v56  ;;  %v687_v44 = vld [vmem:[#allocation10 + $0x2] sm:$0x1] }
 0x6fb   :  { %v527_v46 = vpop.permute.xlu0 %526  ;;  %v640_v48 = vmul.f32 %v636_v32, %v73_v45 }
 0x6fc   :  { %v634_v49 = vsel %vm631_vm12, %v629_v35, %v527_v46  ;;  %v525_v12 = vpop.permute.xlu1 %524  ;;  %v686_v46 = vld [vmem:[#allocation10 + $0x1] sm:$0x1] }
 0x6fd   :  { %v638_v53 = vsub.f32 %v1160_v57, %v634_v49  ;;  %v633_v54 = vsel %vm631_vm12, %v628_v50, %v525_v12  ;;  %v645_v47 = vsel %vm644_vm13, %v640_v48, 0.0 }
 0x6fe   :  { %v637_v59 = vsub.f32 %v1155_v52, %v633_v54  ;;  %646 = vadd.xlane.f32.xlu0 %v645_v47 }
 0x6ff   :  { %v721_v60 = vpop.permute.xlu0 %720  ;;  %v642_v61 = vmul.f32 %v638_v53, %v75_v51  ;;  %v688_v53 = vld [vmem:[#allocation10 + $0x3] sm:$0x1] }
 0x700   :  { %732 = vst.msk [vmem:[#allocation2 - $0x2] sm:$0x8] %vm730_vm14, %v721_v60  ;;  %v529_v63 = vpop.permute.xlu1 %528  ;;  %v641_v0 = vmul.f32 %v637_v59, %v74_v55 }
 0x701   :  { %v635_v1 = vsel %vm631_vm12, %v630_v62, %v529_v63  ;;  %v651_v2 = vsel %vm644_vm13, %v642_v61, 0.0 }
 0x702   :  { %v639_v4 = vsub.f32 %v1162_v58, %v635_v1  ;;  %652 = vadd.xlane.f32.xlu0 %v651_v2  ;;  %v648_v52 = vsel %vm644_vm13, %v641_v0, 0.0 }
 0x703   :  { %v752_v5 = vpop.permute.xlu0 %751  ;;  %649 = vadd.xlane.f32.xlu1 %v648_v52 }
 0x704   :  { %763 = vst.msk [vmem:[#allocation3 - $0x3] sm:$0x8] %vm730_vm14, %v752_v5  ;;  %v719_v38 = vpop.permute.xlu1 %718  ;;  %v643_v6 = vmul.f32 %v639_v4, %v76_v3 }
 0x705   :  { %731 = vst.msk [vmem:[#allocation2 - $0x3] sm:$0x8] %vm730_vm14, %v719_v38 }
 0x706   :  { %v654_v8 = vsel %vm644_vm13, %v643_v6, 0.0 }
 0x707   :  { %655 = vadd.xlane.f32.xlu0 %v654_v8 }
 0x708   :  { %v723_v13 = vpop.permute.xlu1 %722 }
 0x709   :  { %733 = vst.msk [vmem:[#allocation2 - $0x1] sm:$0x8] %vm730_vm14, %v723_v13 }
 0x70c   :  { %v725_v9 = vpop.permute.xlu1 %724 }
 0x70d   :  { %734 = vst.msk [vmem:[#allocation2] sm:$0x8] %vm730_vm14, %v725_v9 }
 0x710   :  { %v754_v10 = vpop.permute.xlu1 %753 }
 0x711   :  { %764 = vst.msk [vmem:[#allocation3 - $0x2] sm:$0x8] %vm730_vm14, %v754_v10 }
 0x714   :  { %757 = vrot.lane.b32.xlu1 %v750_v11, %s926_s9 }
 0x71d   :  { %755 = vrot.lane.b32.xlu0 %v746_v14, %s926_s9 }
 0x78b   :  { %v647_v15 = vpop.xlane.xlu0 %646 }
 0x78c   :  { %v657_v7 = vsel %vm644_vm13, %v647_v15, 0.0 }
 0x78d   :  { %v658_v16 = vrot.slane %v657_v7, 4 }
 0x78f   :  { %v659_v17 = vadd.f32 %v658_v16, %v657_v7  ;;  %v653_v18 = vpop.xlane.xlu0 %652 }
 0x790   :  { %v671_v19 = vsel %vm644_vm13, %v653_v18, 0.0  ;;  %v650_v21 = vpop.xlane.xlu1 %649 }
 0x791   :  { %v660_v23 = vrot.slane %v659_v17, 2  ;;  %v672_v24 = vrot.slane %v671_v19, 4  ;;  %v664_v58 = vsel %vm644_vm13, %v650_v21, 0.0 }
 0x792   :  { %v665_v25 = vrot.slane %v664_v58, 4 }
 0x793   :  { %v661_v27 = vadd.f32 %v660_v23, %v659_v17  ;;  %v673_v28 = vadd.f32 %v672_v24, %v671_v19 }
 0x794   :  { %v666_v29 = vadd.f32 %v665_v25, %v664_v58  ;;  %v656_v57 = vpop.xlane.xlu0 %655  ;;  %v758_v22 = vpop.permute.xlu1 %757 }
 0x795   :  { %v662_v20 = vrot.slane %v661_v27, 1  ;;  %v674_v30 = vrot.slane %v673_v28, 2  ;;  %v678_v33 = vsel %vm644_vm13, %v656_v57, 0.0  ;;  %766 = vst.msk [vmem:[#allocation3] sm:$0x8] %vm730_vm14, %v758_v22 }
 0x796   :  { %v667_v34 = vrot.slane %v666_v29, 2  ;;  %v679_v39 = vrot.slane %v678_v33, 4 }
 0x797   :  { %v663_v31 = vadd.f32 %v662_v20, %v661_v27  ;;  %v675_v37 = vadd.f32 %v674_v30, %v673_v28 }
 0x798   :  { %v668_v36 = vadd.f32 %v667_v34, %v666_v29  ;;  %v680_v40 = vadd.f32 %v679_v39, %v678_v33  ;;  %v756_v41 = vpop.permute.xlu0 %755 }
 0x799   :  { %v689_v42 = vadd.f32 %v685_v26, %v663_v31  ;;  %v676_v43 = vrot.slane %v675_v37, 1  ;;  %765 = vst.msk [vmem:[#allocation3 - $0x1] sm:$0x8] %vm730_vm14, %v756_v41 }
 0x79a   :  { %v669_v45 = vrot.slane %v668_v36, 1  ;;  %v681_v32 = vrot.slane %v680_v40, 2 }
 0x79b   :  { %694 = vst.msk [vmem:[#allocation10] sm:$0x1] %vm60_vm9, %v689_v42  ;;  %v677_v35 = vadd.f32 %v676_v43, %v675_v37 }
 0x79c   :  { %v670_v48 = vadd.f32 %v669_v45, %v668_v36  ;;  %v682_v49 = vadd.f32 %v681_v32, %v680_v40 }
 0x79d   :  { %v691_v50 = vadd.f32 %v687_v44, %v677_v35 }
 0x79e   :  { %v690_v12 = vadd.f32 %v686_v46, %v670_v48  ;;  %v683_v51 = vrot.slane %v682_v49, 1 }
 0x79f   :  { %696 = vst.msk [vmem:[#allocation10 + $0x2] sm:$0x1] %vm60_vm9, %v691_v50 }
 0x7a0   :  { %695 = vst.msk [vmem:[#allocation10 + $0x1] sm:$0x1] %vm60_vm9, %v690_v12  ;;  %v684_v54 = vadd.f32 %v683_v51, %v682_v49 }
 0x7a2   :  { %v692_v47 = vadd.f32 %v688_v53, %v684_v54 }
 0x7a4   :  { %697 = vst.msk [vmem:[#allocation10 + $0x3] sm:$0x1] %vm60_vm9, %v692_v47 }
 0x7a5   :  { %904 = shalt.err (!%p901_p0)
}
 0x7a6   :  { %s905_s4 = scalar_lea.hbm %s1271_s3, 64 }
 0x7a7   :  { %p906_p1 = scmp.ne.s32.totalorder %s1271_s3, %s905_s4  ;;  %p909_p2 = scmp.lt.u32.totalorder %s905_s4, %s1271_s3 }
 0x7a9   :  { %p911_p3 = pnand %p909_p2, %p906_p1 }
 0x7ab   :  { %914 = shalt.err (!%p911_p3)
}
 0x7ac   :  { %778 = dma.vmem_to_hbm [thread:$0]  %s773_s27, 64, %s1271_s3, [#allocation6], %s925_s1, %s925_s1, %s926_s9  }
 0x7ad   :  { %919 = dma.done.wait [#allocation6], 64  }
 0x7ae   :  { %920 = vsyncadd [#allocation6], 4294967232 }
 0x7af   :  { %782 = vsyncpa [#allocation5], 1 }
 0x7b0   :  { %783 = vsyncpa [#allocation8], 1 }
 0x7b1   :  { %784 = vsyncpa [#allocation6], 1 }

</bundles_post_ra>
